<compile_context>
chip_gen: v7x
topology: tpu7x:2x2x1
jax: 0.10.0
libtpu: 0.0.40
codegen_flags: <defaults>
</compile_context>

<pallas_src>
import jax
import jax.numpy as jnp
from jax.experimental import pallas as pl
from jax.experimental.pallas import tpu as pltpu


# ----------------------------------------------------------------------------
# Primary path: Identity.forward(x) == x.  Fastest kernel is no kernel.
# ----------------------------------------------------------------------------
def _identity_alias_kernel(x_ref, o_ref):
    # Output buffer is aliased to the input buffer (input_output_aliases),
    # so the data is already in place: nothing to move, nothing to compute.
    del x_ref, o_ref


def identity(x: jax.Array, *, force_kernel: bool = False) -> jax.Array:
    """Identity.forward(x) == x.

    Default: return x directly (zero cost, fully fusible by XLA).
    force_kernel=True: run an aliased no-op Pallas kernel (for callers that
    require a Pallas call).  Only truly zero-cost if XLA donates the input.
    """
    if not force_kernel or x.ndim == 0 or x.size == 0:
        return x
    return pl.pallas_call(
        _identity_alias_kernel,
        out_shape=jax.ShapeDtypeStruct(x.shape, x.dtype),
        in_specs=[pl.BlockSpec(memory_space=pl.ANY)],
        out_specs=pl.BlockSpec(memory_space=pl.ANY),
        input_output_aliases={0: 0},
    )(x)


# ----------------------------------------------------------------------------
# Materializing variant (fresh output buffer).
# Primary: single HBM->HBM async DMA.  Fallback: tiled VMEM-staged copy.
# ----------------------------------------------------------------------------
def _dma_copy_kernel(x_ref, o_ref, sem):
    # One DMA descriptor streams the whole array HBM->HBM at roofline:
    # no grid steps, no vld/vst, no VMEM double-buffer footprint.
    cp = pltpu.make_async_copy(x_ref, o_ref, sem)
    cp.start()
    cp.wait()


def _identity_copy_dma(x: jax.Array) -> jax.Array:
    return pl.pallas_call(
        _dma_copy_kernel,
        out_shape=jax.ShapeDtypeStruct(x.shape, x.dtype),
        in_specs=[pl.BlockSpec(memory_space=pl.ANY)],
        out_specs=pl.BlockSpec(memory_space=pl.ANY),
        scratch_shapes=[pltpu.SemaphoreType.DMA(())],
        cost_estimate=pl.CostEstimate(
            flops=0, transcendentals=0, bytes_accessed=2 * x.size * x.dtype.itemsize
        ),
    )(x)


# -------------------------- tiled fallback path ------------------------------
def _copy_kernel(x_ref, o_ref):
    o_ref[...] = x_ref[...]


_LANES = 128
_MAX_COLS = 32 * 1024  # lane-dense slab width cap


def _vmem_limits():
    """Generation-aware (vmem_limit_bytes, tile_budget_bytes)."""
    try:
        cap = pltpu.get_tpu_info().vmem_capacity_bytes
    except Exception:
        cap = 64 * 1024 * 1024  # conservative (v7x per-TC)
    limit = min(cap // 2, 64 * 1024 * 1024)      # 64 MiB on v5e/v6e, 32 MiB on v7x
    tile_budget = (3 * limit) // 4               # 48 MiB / 24 MiB for in+out dbl-buffers
    return limit, tile_budget


def _lane_dense_2d(x: jax.Array):
    """Flatten to (rows, cols) with cols a large multiple of 128 whenever possible."""
    n = x.size
    cols = 0
    if n % _LANES == 0:
        cols = _LANES
        while cols * 2 <= _MAX_COLS and n % (cols * 2) == 0 and n // (cols * 2) >= 8:
            cols *= 2
    else:
        # Largest divisor of n that is a multiple of 128 and <= _MAX_COLS.
        c = (min(_MAX_COLS, n) // _LANES) * _LANES
        while c >= _LANES:
            if n % c == 0:
                cols = c
                break
            c -= _LANES
        if cols == 0:
            # No lane-dense factorization: widest possible lane dim, one row.
            cols = n
    rows = n // cols
    return x.reshape(rows, cols), rows, cols


def _identity_copy_tiled(x: jax.Array) -> jax.Array:
    orig_shape = x.shape
    x2, rows, cols = _lane_dense_2d(x)
    itemsize = x2.dtype.itemsize
    vmem_limit, tile_budget = _vmem_limits()

    # Dtype-aware sublane granularity: 8 rows for 4-byte, 16 for 2-byte, 32 for 1-byte.
    sub = max(8, 32 // itemsize)

    # Byte-sized tiles: the largest row tile whose in+out double buffers fit
    # the per-generation budget (no fixed 512-row cap).
    max_rows_by_vmem = max(sub, tile_budget // (4 * cols * itemsize))
    tile_rows = min(rows, max_rows_by_vmem)
    if tile_rows < rows:
        tile_rows = max(sub, (tile_rows // sub) * sub)  # packed-tile-aligned partial
    else:
        tile_rows = rows                                # full extent: always legal
    grid_rows = pl.cdiv(rows, tile_rows)

    nbytes = x.size * itemsize
    out2 = pl.pallas_call(
        _copy_kernel,
        out_shape=jax.ShapeDtypeStruct((rows, cols), x2.dtype),
        grid=(grid_rows,),
        in_specs=[pl.BlockSpec((tile_rows, cols), lambda i: (i, 0))],
        out_specs=pl.BlockSpec((tile_rows, cols), lambda i: (i, 0)),
        compiler_params=pltpu.CompilerParams(
            dimension_semantics=("parallel",),
            vmem_limit_bytes=vmem_limit,
        ),
        cost_estimate=pl.CostEstimate(
            flops=0, transcendentals=0, bytes_accessed=2 * nbytes
        ),
    )(x2)
    return out2.reshape(orig_shape)


def identity_copy(x: jax.Array) -> jax.Array:
    """Identity that materializes a fresh output buffer."""
    if x.ndim == 0 or x.size == 0:
        return x + jnp.zeros_like(x) if x.ndim == 0 else x
    try:
        return _identity_copy_dma(x)
    except Exception:
        # Fallback if HBM->HBM DMA is rejected for this shape/dtype.
        return _identity_copy_tiled(x)


if __name__ == "__main__":
    key = jax.random.PRNGKey(0)
    # Small NCHW input consistent with an FCN-style module: batch=2, C=4, 16x16.
    x = jax.random.normal(key, (2, 4, 16, 16), dtype=jnp.float32)

    # Primary path: no kernel at all.
    y = identity(x)
    jax.block_until_ready(y)
    assert y.shape == x.shape and y.dtype == x.dtype
    assert bool(jnp.all(y == x))

    # Aliased no-op Pallas kernel (only when a kernel is mandated).
    y_k = identity(x, force_kernel=True)
    jax.block_until_ready(y_k)
    assert y_k.shape == x.shape and y_k.dtype == x.dtype
    assert bool(jnp.all(y_k == x))

    # Materializing variant: single HBM->HBM DMA (tiled fallback otherwise).
    y2 = identity_copy(x)
    jax.block_until_ready(y2)
    assert y2.shape == x.shape and y2.dtype == x.dtype
    assert bool(jnp.all(y2 == x))

    print("KERNEL_OK")
</pallas_src>

<mosaic_0001>
module attributes {stable_mosaic.version = 11 : i64} {
  func.func @_identity_alias_kernel(%arg0: memref<2x4x16x16xf32, #tpu.memory_space<any>>, %arg1: memref<2x4x16x16xf32, #tpu.memory_space<any>>) attributes {dimension_semantics = [], scalar_prefetch = 0 : i64, scratch_operands = 0 : i64, tpu.core_type = #tpu.core_type<tc>} {
    return
  }
}

</mosaic_0001>

<bundles_post_ra>
// kernel: tpu_custom_call.1
= control target key start
LH: loop header
LB: loop body
LE: loop exit
PB: predicated region body
PF: predicated region fallthrough
CT: control target
= control target key end

     0   :  { %s16_s0 = inlined_call_operand.hbm [shape: f32[2,4,16,16], index: 0, kind: input, shape index: {}, may-alias: {0,1}]   ;;  %s17_s1 = inlined_call_operand.hbm [shape: f32[2,4,16,16], index: 1, kind: output, shape index: {}, may-alias: {0,1}]  }

</bundles_post_ra>
